<compile_context>
chip_gen: v7x
topology: tpu7x:2x2x1
jax: 0.10.0
libtpu: 0.0.40
codegen_flags: <defaults>
</compile_context>

<pallas_src>
import functools

import jax
import jax.numpy as jnp
from jax.experimental import pallas as pl
from jax.experimental.pallas import tpu as pltpu


_LANES = 128
_MAX_TILE_POINTS = 262144  # points per grid step -> ~4 MiB HBM traffic per step


def _weak_persp_kernel(pts_ref, scale_ref, trans_ref, out_ref):
    """Projects one (batch, row-tile) block.

    pts_ref:   (1, 2, TR, 128) VMEM  channel-major x/y slabs
    scale_ref: (B,)            SMEM  per-batch scale
    trans_ref: (2*B,)          SMEM  per-batch translation [tx0, ty0, tx1, ...]
    out_ref:   (1, 2, TR, 128) VMEM  projected x/y slabs
    """
    b = pl.program_id(0)
    s = scale_ref[b]
    tx = trans_ref[2 * b]
    ty = trans_ref[2 * b + 1]

    # Full (TR, 128) slabs: every vreg is 8 sublanes x 128 lanes, unmasked stores.
    out_ref[0, 0] = (s * (pts_ref[0, 0] + tx)).astype(out_ref.dtype)
    out_ref[0, 1] = (s * (pts_ref[0, 1] + ty)).astype(out_ref.dtype)


@functools.partial(jax.jit, static_argnames=("max_tile_points",))
def weak_perspective_camera(points, scale, translation, *,
                            max_tile_points=_MAX_TILE_POINTS):
    """points: (B, N, C>=2), scale: (B, 1), translation: (B, 2) -> (B, N, 2)."""
    assert translation.shape[-1] == 2, 'Translation shape must be -1x2'
    assert scale.shape[-1] == 1, 'Scale shape must be -1x1'
    B, N, C = points.shape
    assert C >= 2, 'points must have at least x and y coordinates'
    dtype = points.dtype

    n_pad = pl.cdiv(N, _LANES) * _LANES
    rows = n_pad // _LANES

    # Drop z, go channel-major, pad N up to a lane multiple.  The slice +
    # transpose + pad fuse into a single XLA copy; the 4-D view is metadata-only.
    pts_cm = jnp.transpose(points[:, :, :2], (0, 2, 1))        # (B, 2, N)
    if n_pad != N:
        pts_cm = jnp.pad(pts_cm, ((0, 0), (0, 0), (0, n_pad - N)))
    pts_4d = pts_cm.reshape(B, 2, rows, _LANES)                # (B, 2, rows, 128)

    scale_flat = scale.reshape(B).astype(dtype)                # (B,)   -> SMEM
    trans_flat = translation.reshape(2 * B).astype(dtype)      # (2B,)  -> SMEM

    # Row-tile size: multiple of 8 sublanes unless we take the whole row extent
    # in one block (a full-extent dim is always a legal block size).
    max_tile_rows = max(1, max_tile_points // _LANES)
    if rows <= max_tile_rows:
        tr = rows
    else:
        tr = max(8, (max_tile_rows // 8) * 8)

    # v7x has 2 TensorCores: make sure the parallel grid has >= 2 steps when the
    # problem is big enough to split (no effect on v5e/v6e's single TC).
    if B * pl.cdiv(rows, tr) < 2 and rows >= 2:
        tr_split = pl.cdiv(pl.cdiv(rows, 2), 8) * 8
        if tr_split < rows:
            tr = tr_split

    grid = (B, pl.cdiv(rows, tr))

    cost = pl.CostEstimate(
        flops=4 * B * N,                                  # add + mul, two channels
        transcendentals=0,
        bytes_accessed=4 * B * n_pad * dtype.itemsize,    # 2 chans in + 2 chans out
    )

    out_4d = pl.pallas_call(
        _weak_persp_kernel,
        out_shape=jax.ShapeDtypeStruct((B, 2, rows, _LANES), dtype),
        grid_spec=pltpu.PrefetchScalarGridSpec(
            num_scalar_prefetch=0,
            grid=grid,
            in_specs=[
                pl.BlockSpec((1, 2, tr, _LANES), lambda b, r: (b, 0, r, 0)),
                pl.BlockSpec(memory_space=pltpu.MemorySpace.SMEM),
                pl.BlockSpec(memory_space=pltpu.MemorySpace.SMEM),
            ],
            out_specs=pl.BlockSpec((1, 2, tr, _LANES), lambda b, r: (b, 0, r, 0)),
        ),
        compiler_params=pltpu.CompilerParams(
            dimension_semantics=("parallel", "parallel"),
            vmem_limit_bytes=32 << 20),
        cost_estimate=cost,
    )(pts_4d, scale_flat, trans_flat)

    # Back to the PyTorch (B, N, 2) contract (wrapper-side layout plumbing; see
    # module docstring — drop this if callers can accept channel-major output).
    out_cm = out_4d.reshape(B, 2, n_pad)[:, :, :N]
    return jnp.transpose(out_cm, (0, 2, 1))


def _reference(points, scale, translation):
    return scale.reshape(-1, 1, 1) * (points[:, :, :2] + translation.reshape(-1, 1, 2))


if __name__ == "__main__":
    key = jax.random.PRNGKey(0)

    def make_inputs(k, B, N):
        k1, k2, k3 = jax.random.split(k, 3)
        points = jax.random.normal(k1, (B, N, 3), dtype=jnp.float32)
        scale = jax.random.uniform(k2, (B, 1), dtype=jnp.float32,
                                   minval=0.5, maxval=2.0)
        translation = jax.random.normal(k3, (B, 2), dtype=jnp.float32)
        return points, scale, translation

    # (fold, B, N, max_tile_points):
    #   tiny padded N / exact rows / partial lane pad /
    #   forced row tiling with a partial edge tile / forced v7x 2-way split.
    cases = [
        (0, 2, 8, _MAX_TILE_POINTS),      # rows=1, single tiny tile per batch
        (1, 3, 512, _MAX_TILE_POINTS),    # rows=4, full-extent tile per batch
        (2, 2, 320, _MAX_TILE_POINTS),    # N padded 320->384, rows=3
        (3, 1, 1280, 1024),               # rows=10, tr=8 -> partial edge tile
        (4, 1, 2048, _MAX_TILE_POINTS),   # rows=16 -> split to tr=8 (2 steps)
    ]

    for fold, B, N, mtp in cases:
        points, scale, translation = make_inputs(jax.random.fold_in(key, fold), B, N)
        out = weak_perspective_camera(points, scale, translation,
                                      max_tile_points=mtp)
        out = jax.block_until_ready(out)
        ref = _reference(points, scale, translation)
        assert out.shape == (B, N, 2), out.shape
        assert jnp.allclose(out, ref, atol=1e-6, rtol=1e-6), (
            f"mismatch for B={B}, N={N}, max_tile_points={mtp}")

    print("KERNEL_OK")
</pallas_src>

<mosaic_0001>
module attributes {stable_mosaic.version = 11 : i64} {
  func.func @_weak_persp_kernel(%arg0: i32, %arg1: i32, %arg2: memref<1x2x1x128xf32, #tpu.memory_space<vmem>>, %arg3: memref<2xf32, #tpu.memory_space<smem>>, %arg4: memref<4xf32, #tpu.memory_space<smem>>, %arg5: memref<1x2x1x128xf32, #tpu.memory_space<vmem>>) attributes {dimension_semantics = [#tpu.dimension_semantics<parallel>, #tpu.dimension_semantics<parallel>], iteration_bounds = array<i64: 2, 1>, scalar_prefetch = 0 : i64, scratch_operands = 0 : i64, tpu.core_type = #tpu.core_type<tc>, window_params = [{transform_indices = @transform_0, window_bounds = array<i64: 1, 2, 1, 128>}, {transform_indices = @transform_1, window_bounds = array<i64: 2>}, {transform_indices = @transform_2, window_bounds = array<i64: 4>}, {transform_indices = @transform_3, window_bounds = array<i64: 1, 2, 1, 128>}]} {
    %0 = arith.index_cast %arg0 : i32 to index
    %1 = memref.load %arg3[%0] : memref<2xf32, #tpu.memory_space<smem>>
    %c2_i32 = arith.constant 2 : i32
    %2 = arith.muli %c2_i32, %arg0 : i32
    %3 = arith.index_cast %2 : i32 to index
    %4 = memref.load %arg4[%3] : memref<4xf32, #tpu.memory_space<smem>>
    %c2_i32_0 = arith.constant 2 : i32
    %5 = arith.muli %c2_i32_0, %arg0 : i32
    %c1_i32 = arith.constant 1 : i32
    %6 = arith.addi %5, %c1_i32 : i32
    %7 = arith.index_cast %6 : i32 to index
    %8 = memref.load %arg4[%7] : memref<4xf32, #tpu.memory_space<smem>>
    %c0 = arith.constant 0 : index
    %c0_1 = arith.constant 0 : index
    %c0_2 = arith.constant 0 : index
    %c0_3 = arith.constant 0 : index
    %9 = vector.load %arg2[%c0, %c0_1, %c0_2, %c0_3] : memref<1x2x1x128xf32, #tpu.memory_space<vmem>>, vector<1x1x1x128xf32>
    %10 = vector.shape_cast %9 : vector<1x1x1x128xf32> to vector<1x128xf32>
    %11 = vector.broadcast %4 : f32 to vector<1x128xf32>
    %12 = arith.addf %10, %11 : vector<1x128xf32>
    %13 = vector.broadcast %1 : f32 to vector<1x128xf32>
    %14 = arith.mulf %13, %12 : vector<1x128xf32>
    %c0_4 = arith.constant 0 : index
    %c0_5 = arith.constant 0 : index
    %c0_6 = arith.constant 0 : index
    %c0_7 = arith.constant 0 : index
    %15 = vector.load %arg5[%c0_4, %c0_5, %c0_6, %c0_7] : memref<1x2x1x128xf32, #tpu.memory_space<vmem>>, vector<1x1x1x128xf32>
    %16 = vector.shape_cast %15 : vector<1x1x1x128xf32> to vector<1x128xf32>
    %17 = vector.shape_cast %14 : vector<1x128xf32> to vector<1x1x1x128xf32>
    tpu.vector_store %arg5[%c0_4, %c0_5, %c0_6, %c0_7], %17 {strides = array<i32>} : memref<1x2x1x128xf32, #tpu.memory_space<vmem>>, vector<1x1x1x128xf32>,
    %c0_8 = arith.constant 0 : index
    %c1 = arith.constant 1 : index
    %c0_9 = arith.constant 0 : index
    %c0_10 = arith.constant 0 : index
    %18 = vector.load %arg2[%c0_8, %c1, %c0_9, %c0_10] : memref<1x2x1x128xf32, #tpu.memory_space<vmem>>, vector<1x1x1x128xf32>
    %19 = vector.shape_cast %18 : vector<1x1x1x128xf32> to vector<1x128xf32>
    %20 = vector.broadcast %8 : f32 to vector<1x128xf32>
    %21 = arith.addf %19, %20 : vector<1x128xf32>
    %22 = vector.broadcast %1 : f32 to vector<1x128xf32>
    %23 = arith.mulf %22, %21 : vector<1x128xf32>
    %c0_11 = arith.constant 0 : index
    %c1_12 = arith.constant 1 : index
    %c0_13 = arith.constant 0 : index
    %c0_14 = arith.constant 0 : index
    %24 = vector.load %arg5[%c0_11, %c1_12, %c0_13, %c0_14] : memref<1x2x1x128xf32, #tpu.memory_space<vmem>>, vector<1x1x1x128xf32>
    %25 = vector.shape_cast %24 : vector<1x1x1x128xf32> to vector<1x128xf32>
    %26 = vector.shape_cast %23 : vector<1x128xf32> to vector<1x1x1x128xf32>
    tpu.vector_store %arg5[%c0_11, %c1_12, %c0_13, %c0_14], %26 {strides = array<i32>} : memref<1x2x1x128xf32, #tpu.memory_space<vmem>>, vector<1x1x1x128xf32>,
    return
  }
  func.func @transform_0(%arg0: i32, %arg1: i32) -> (i32, i32, i32, i32) {
    %c0_i32 = arith.constant 0 : i32
    %c0_i32_0 = arith.constant 0 : i32
    %c0_i32_1 = arith.constant 0 : i32
    return %arg0, %c0_i32, %arg1, %c0_i32_0 : i32, i32, i32, i32
  }
  func.func @transform_1(%arg0: i32, %arg1: i32) -> i32 {
    %c0_i32 = arith.constant 0 : i32
    %c0_i32_0 = arith.constant 0 : i32
    return %c0_i32 : i32
  }
  func.func @transform_2(%arg0: i32, %arg1: i32) -> i32 {
    %c0_i32 = arith.constant 0 : i32
    %c0_i32_0 = arith.constant 0 : i32
    return %c0_i32 : i32
  }
  func.func @transform_3(%arg0: i32, %arg1: i32) -> (i32, i32, i32, i32) {
    %c0_i32 = arith.constant 0 : i32
    %c0_i32_0 = arith.constant 0 : i32
    %c0_i32_1 = arith.constant 0 : i32
    return %arg0, %c0_i32, %arg1, %c0_i32_0 : i32, i32, i32, i32
  }
}

</mosaic_0001>

<bundles_post_ra>
// kernel: weak_perspective_camera.1
= control target key start
LH: loop header
LB: loop body
LE: loop exit
PB: predicated region body
PF: predicated region fallthrough
CT: control target
= control target key end

     0   :  { %8 = vsyncpa [#allocation3], 0  ;;  %s562_s0 = inlined_call_operand.vmem [shape: f32[2,2,1,128], index: 0, kind: input, shape index: {}]   ;;  %s563_s1 = inlined_call_operand.vmem [shape: f32[2], index: 1, kind: input, shape index: {}]   ;;  %s564_s2 = inlined_call_operand.vmem [shape: f32[4], index: 2, kind: input, shape index: {}]   ;;  %s565_s3 = inlined_call_operand.vmem [shape: f32[2,2,1,128], index: 3, kind: output, shape index: {}]  }
   0x1   :  { %9 = vsyncpa [#allocation5], 0  ;;  %s484_s12 = smov 0   ;;  %s486_s13 = smov 0  }
   0x2   :  { %s488_s14 = smov 0  }
   0x3 LB: > { %s339_s15 = sadd.s32 4294967295, %s460_s14   ;;  %s27_s16 = sadd.s32 1, %s456_s13  ;;  %s460_s14 = sphi %s488_s14, %s15_s14   ;;  %s456_s13 = sphi %s486_s13, %s575_s13   ;;  %s452_s12 = sphi %s484_s12, %s574_s12  }
   0x4   : > { %p29_p0 = scmp.ge.s32.totalorder %s27_s16, 2  ;;  %p341_p1 = scmp.ge.s32.totalorder %s460_s14, 1 }
   0x5   : > { %p130_p2 = scmp.lt.s32.totalorder %s460_s14, 3  ;;  %p509_p4 = scmp.eq.s32.totalorder %s339_s15, 0 }
   0x6   : > { %s577_s16 = smov (%p29_p0, %s27_s16), 0  ;;  %s143_s21 = sshll.u32 %s563_s1, 4  ;;  %s144_s21 = int_to_ptr.vmem [resolvable:$true] %s143_s21 }
   0x7   : > { %p505_p3 = pnand %p341_p1, %p130_p2  ;;  %s154_s24 = sshll.u32 %s564_s2, 4  ;;  %s155_s24 = int_to_ptr.vmem [resolvable:$true] %s154_s24 }
   0x8   : > { %s570_s18 = scalar_select %p509_p4, 1, 0 }
   0x9   : > { %s569_s17 = scalar_select %p505_p3, 1, 0 }
   0xa   : > { %p363_p5 = pneg %p505_p3  ;;  %s400_s26 = scalar_lea.vmem %s144_s21, 16 }
   0xb   : > { %p401_p7 = scmp.ne.s32.totalorder %s144_s21, %s400_s26  ;;  %p408_p11 = scmp.lt.s32.totalorder %s144_s21, %s144_s21 }
   0xc   : > { %p523_p6 = pnand %p509_p4, %p363_p5  ;;  %p409_p12 = scmp.lt.s32.totalorder %s400_s26, %s400_s26 }
   0xe   : > { %p402_p8 = pneg %p523_p6  ;;  %p410_p13 = por %p409_p12, %p408_p11 }
  0x10   : > { %p403_p9 = pnand %p402_p8, %p401_p7 }
  0x12   : > { %p404_p10 = pneg %p403_p9 }
  0x14   : > { %p411_p0 = pnand %p410_p13, %p404_p10 }
  0x16   : > { %414 = shalt.err (!%p411_p0)
}
  0x17   : > { %s462_s27 = smov [#allocation2]   ;;  %s415_s28 = scalar_lea.vmem %s155_s24, 16 }
  0x18   : > { %366 = dma.vmem_to_smem (!%p523_p6), %s144_s21, 16, %s462_s27, [#allocation3]  }
  0x19   : > { %p416_p1 = scmp.ne.s32.totalorder %s155_s24, %s415_s28  ;;  %p423_p4 = scmp.lt.s32.totalorder %s155_s24, %s155_s24 }
  0x1a   : > { %p424_p3 = scmp.lt.s32.totalorder %s415_s28, %s415_s28 }
  0x1b   : > { %p418_p2 = pnand %p416_p1, %p402_p8 }
  0x1c   : > { %p425_p7 = por %p424_p3, %p423_p4 }
  0x1d   : > { %p419_p5 = pneg %p418_p2 }
  0x1f   : > { %p426_p9 = pnand %p425_p7, %p419_p5 }
  0x21   : > { %429 = shalt.err (!%p426_p9)
}
  0x22   : > { %s463_s29 = smov [#allocation4]   ;;  %p572_p10 = scmp.ne.s32.totalorder %s569_s17, 0 }
  0x23   : > { %369 = dma.vmem_to_smem (!%p523_p6), %s155_s24, 16, %s463_s29, [#allocation5]  }
  0x24   : > { %177 = sbr.rel (%p572_p10) target bundleno = 64 (0x40), region = 32  ;;  %p573_p11 = scmp.ne.s32.totalorder (!%p572_p10), %s570_s18, 0 }
  0x2b   : > { %443 = dma.done.wait (%p573_p11), [#allocation3], 16  }
  0x2c   : > { %445 = vsyncadd (%p573_p11), [#allocation3], 4294967280 }
  0x2d   : > { %447 = dma.done.wait (%p573_p11), [#allocation5], 16  }
  0x2e   : > { %449 = vsyncadd (%p573_p11), [#allocation5], 4294967280 }
  0x2f   : > { %187 = sfence }
  0x30   : > { %p210_p3 = scmp.lt.s32.totalorder %s452_s12, 1  ;;  %s224_s30 = sld [smem:[#allocation2 + %s452_s12]] }
  0x31   : > { %s350_s4 = sshll.u32 %s452_s12, 1 }
  0x32   : > { %s579_s12 = smov (!%p210_p3, %s452_s12), 1  ;;  %s226_s5 = sld [smem:[#allocation4 + %s350_s4]] }
  0x33   : > { %s227_s6 = sadd.s32 1, %s350_s4  ;;  %s348_s7 = sshll.u32 %s579_s12, 1 }
  0x34   : > { %s228_s8 = sld [smem:[#allocation4 + %s227_s6]]  ;;  %s216_s11 = scalar_lea.vmem %s562_s0, %s348_s7 }
  0x35   : > { %v229_v0 = vld [vmem:[%s216_s11] sm:$0x1]  ;;  %v351_v1 = vld [vmem:[%s216_s11 + $0x1] sm:$0x1]  ;;  %s223_s18 = scalar_lea.vmem %s565_s3, %s348_s7 }
  0x36   : > { %v232_v3 = vstv %s224_s30 }
  0x38   : > { %v230_v2 = vstv %s226_s5 }
  0x39   : > { %v231_v4 = vadd.f32 %v230_v2, %v229_v0 }
  0x3a   : > { %v237_v5 = vstv %s228_s8 }
  0x3b   : > { %v238_v6 = vadd.f32 %v351_v1, %v237_v5  ;;  %v233_v7 = vmul.f32 %v232_v3, %v231_v4 }
  0x3d   : > { %v239_v8 = vmul.f32 %v238_v6, %v232_v3  ;;  %234 = vst [vmem:[%s223_s18] sm:$0x1] %v233_v7 }
  0x3f   : > { %352 = vst [vmem:[%s223_s18 + $0x1] sm:$0x1] %v239_v8 }
  0x40 PF: > { %s15_s14 = sadd.s32 1, %s460_s14   ;;  %s574_s12 = smov %s456_s13 }
  0x41   : > { %p12_p4 = scmp.ge.s32.totalorder %s15_s14, 4   ;;  %s575_s13 = smov %s577_s16 }
  0x43   :  { %14 = sbr.rel (!%p12_p4) target bundleno = 3 (0x3), region = 73 }
  0x4a   :  { %267 = vsyncpa [#allocation3], 1 }
  0x4b   :  { %269 = vsyncpa [#allocation3 + $0x1], 1 }
  0x4c   :  { %270 = vsyncpa [#allocation5], 1 }

</bundles_post_ra>
